<compile_context>
chip_gen: v6e
topology: v6e:2x2x1
jax: 0.10.0
libtpu: 0.0.40
codegen_flags: <defaults>
</compile_context>

<pallas_src>
import numpy as np
import jax
import jax.numpy as jnp
from jax.experimental import pallas as pl
from jax.experimental.pallas import tpu as pltpu


# ------------------------- Pallas kernels -------------------------

def _embed_z_lstm_kernel(z_ref, wz_ref, bz_ref, wih_ref, whh_ref, bg_ref,
                         ez_ref):
    """func_embed_z: x = relu(Linear(z)); LSTM over T steps (constant input).

    z_ref:   (B, Z)      wz_ref:  (Z, H)     bz_ref: (1, H)
    wih_ref: (H, 4H)     whh_ref: (H, 4H)    bg_ref: (1, 4H)
        fused gate order (i, f, g, o); bg = b_ih + b_hh; weights transposed.
    ez_ref:  (T, B, H)   full LSTM output sequence (time-major).
    """
    x = jnp.maximum(
        jnp.dot(z_ref[...], wz_ref[...], preferred_element_type=jnp.float32)
        + bz_ref[...], 0.0)                                   # (B, H)
    B = x.shape[0]
    H = wz_ref.shape[1]
    T = ez_ref.shape[0]
    # Input projection is identical at every step -> hoist it (one fused matmul).
    xw = (jnp.dot(x, wih_ref[...], preferred_element_type=jnp.float32)
          + bg_ref[...])                                      # (B, 4H)
    whh = whh_ref[...]
    h = jnp.zeros((B, H), jnp.float32)
    c = jnp.zeros((B, H), jnp.float32)
    hs = []
    for _ in range(T):          # T is small & static: unrolled is fine here
        gates = xw + jnp.dot(h, whh, preferred_element_type=jnp.float32)
        i_g = jax.nn.sigmoid(gates[:, 0 * H:1 * H])
        f_g = jax.nn.sigmoid(gates[:, 1 * H:2 * H])
        g_g = jnp.tanh(gates[:, 2 * H:3 * H])
        o_g = jax.nn.sigmoid(gates[:, 3 * H:4 * H])
        c = f_g * c + i_g * g_g
        h = o_g * jnp.tanh(c)
        hs.append(h)
    # Single bulk store instead of T masked (B, H) partial stores.
    ez_ref[...] = jnp.stack(hs, axis=0)


def _decoder_compute(obs, ez, wo, bo, wh, bh, wout, bout):
    """relu(embed_obs(obs)) + ez -> relu(hidden) -> out."""
    obs_e = jnp.maximum(
        jnp.dot(obs, wo, preferred_element_type=jnp.float32) + bo, 0.0)
    x = obs_e + ez
    h1 = jnp.maximum(
        jnp.dot(x, wh, preferred_element_type=jnp.float32) + bh, 0.0)
    return jnp.dot(h1, wout, preferred_element_type=jnp.float32) + bout


def _decoder_step_kernel(counter_ref, obs_ref, ez_ref, wo_ref, bo_ref,
                         wh_ref, bh_ref, wout_ref, bout_ref, out_ref):
    """forward(obs) for one step.  counter_ref is the scalar-prefetch SMEM ref;
    the BlockSpec index_map uses it to DMA only embedded_z[counter]."""
    out_ref[...] = _decoder_compute(
        obs_ref[...], ez_ref[0], wo_ref[...], bo_ref[...],
        wh_ref[...], bh_ref[...], wout_ref[...], bout_ref[...])


def _decoder_rollout_kernel(obs_ref, ez_ref, wo_ref, bo_ref,
                            wh_ref, bh_ref, wout_ref, bout_ref, out_ref):
    """All decoder steps fused: grid axis = time step; weights stay resident."""
    out_ref[0] = _decoder_compute(
        obs_ref[0], ez_ref[0], wo_ref[...], bo_ref[...],
        wh_ref[...], bh_ref[...], wout_ref[...], bout_ref[...])


# ------------------------- Module wrapper -------------------------

class StateConditionedDecoderPallas:
    def __init__(self, z_dim, out_dim, obs_dim, seq_length, hidden_dim=128,
                 key=None):
        self.z_dim, self.out_dim, self.obs_dim = z_dim, out_dim, obs_dim
        self.seq_length, self.hidden_dim = seq_length, hidden_dim
        if key is None:
            key = jax.random.PRNGKey(0)

        def uniform(k, shape, fan_in):
            bound = 1.0 / np.sqrt(fan_in)
            return jax.random.uniform(k, shape, jnp.float32, -bound, bound)

        H = hidden_dim
        ks = jax.random.split(key, 12)
        # embed_z: Linear(z_dim, H)
        self.wz = uniform(ks[0], (z_dim, H), z_dim)
        self.bz = uniform(ks[1], (1, H), z_dim)
        # embed_obs: Linear(obs_dim, H)
        self.wo = uniform(ks[2], (obs_dim, H), obs_dim)
        self.bo = uniform(ks[3], (1, H), obs_dim)
        # LSTM(H, H): fused gate weights, order (i, f, g, o), pre-transposed.
        self.wih = uniform(ks[4], (H, 4 * H), H)
        self.whh = uniform(ks[5], (H, 4 * H), H)
        b_ih = uniform(ks[6], (4 * H,), H)
        b_hh = uniform(ks[7], (4 * H,), H)
        self.bg = (b_ih + b_hh).reshape(1, 4 * H)
        # hidden: Linear(H, 64)
        self.wh = uniform(ks[8], (H, 64), H)
        self.bh = uniform(ks[9], (1, 64), H)
        # out: Linear(64, out_dim)
        self.wout = uniform(ks[10], (64, out_dim), 64)
        self.bout = uniform(ks[11], (1, out_dim), 64)

        self.embedded_z = None
        self.counter = 0

        T, OBS, OUT = seq_length, obs_dim, out_dim

        # ---- jitted pallas wrappers (built once; traced per input shape) ----

        def _embed_impl(z, wz, bz, wih, whh, bg):
            B = z.shape[0]
            # Whole problem fits in VMEM: no grid, full-array refs.
            return pl.pallas_call(
                _embed_z_lstm_kernel,
                out_shape=jax.ShapeDtypeStruct((T, B, H), jnp.float32),
            )(z, wz, bz, wih, whh, bg)

        def _step_impl(counter, obs, ez, wo, bo, wh, bh, wout, bout):
            B = obs.shape[0]
            counter = jnp.minimum(counter, T - 1)   # bound the DMA index
            grid_spec = pltpu.PrefetchScalarGridSpec(
                num_scalar_prefetch=1,
                grid=(1,),
                in_specs=[
                    pl.BlockSpec((B, OBS), lambda i, c: (0, 0)),
                    # select embedded_z[counter] via scalar-prefetched index
                    pl.BlockSpec((1, B, H), lambda i, c: (c[0], 0, 0)),
                    pl.BlockSpec((OBS, H), lambda i, c: (0, 0)),
                    pl.BlockSpec((1, H), lambda i, c: (0, 0)),
                    pl.BlockSpec((H, 64), lambda i, c: (0, 0)),
                    pl.BlockSpec((1, 64), lambda i, c: (0, 0)),
                    pl.BlockSpec((64, OUT), lambda i, c: (0, 0)),
                    pl.BlockSpec((1, OUT), lambda i, c: (0, 0)),
                ],
                out_specs=pl.BlockSpec((B, OUT), lambda i, c: (0, 0)),
            )
            return pl.pallas_call(
                _decoder_step_kernel,
                out_shape=jax.ShapeDtypeStruct((B, OUT), jnp.float32),
                grid_spec=grid_spec,
                compiler_params=pltpu.CompilerParams(
                    dimension_semantics=("arbitrary",)),
            )(counter, obs, ez, wo, bo, wh, bh, wout, bout)

        def _rollout_impl(obs_seq, ez, wo, bo, wh, bh, wout, bout):
            Tn, B = obs_seq.shape[0], obs_seq.shape[1]
            grid_spec = pltpu.PrefetchScalarGridSpec(
                num_scalar_prefetch=0,
                grid=(Tn,),
                in_specs=[
                    pl.BlockSpec((1, B, OBS), lambda t: (t, 0, 0)),
                    pl.BlockSpec((1, B, H), lambda t: (t, 0, 0)),
                    # weights: constant block index -> fetched once, resident
                    pl.BlockSpec((OBS, H), lambda t: (0, 0)),
                    pl.BlockSpec((1, H), lambda t: (0, 0)),
                    pl.BlockSpec((H, 64), lambda t: (0, 0)),
                    pl.BlockSpec((1, 64), lambda t: (0, 0)),
                    pl.BlockSpec((64, OUT), lambda t: (0, 0)),
                    pl.BlockSpec((1, OUT), lambda t: (0, 0)),
                ],
                out_specs=pl.BlockSpec((1, B, OUT), lambda t: (t, 0, 0)),
            )
            return pl.pallas_call(
                _decoder_rollout_kernel,
                out_shape=jax.ShapeDtypeStruct((Tn, B, OUT), jnp.float32),
                grid_spec=grid_spec,
                compiler_params=pltpu.CompilerParams(
                    dimension_semantics=("parallel",)),
            )(obs_seq, ez, wo, bo, wh, bh, wout, bout)

        self._embed_jit = jax.jit(_embed_impl)
        self._step_jit = jax.jit(_step_impl)
        self._rollout_jit = jax.jit(_rollout_impl)

    def reset_hidden_state(self, x):
        # Mirrors the PyTorch module (state is never consumed by forward()).
        self.hn = jnp.zeros((1, x.shape[0], self.hidden_dim), jnp.float32)
        self.cn = jnp.zeros((1, x.shape[0], self.hidden_dim), jnp.float32)

    def func_embed_z(self, z):
        self.embedded_z = self._embed_jit(z, self.wz, self.bz, self.wih,
                                          self.whh, self.bg)
        self.counter = 0
        return self.embedded_z

    def forward(self, obs):
        counter = jnp.asarray([self.counter], dtype=jnp.int32)
        out = self._step_jit(counter, obs, self.embedded_z, self.wo, self.bo,
                             self.wh, self.bh, self.wout, self.bout)
        self.counter += 1
        return out

    def forward_rollout(self, obs_seq):
        """All seq_length decoder steps fused in one pallas_call.
        obs_seq: (T, B, obs_dim)  ->  (T, B, out_dim); equals T forward() calls."""
        out = self._rollout_jit(obs_seq, self.embedded_z, self.wo, self.bo,
                                self.wh, self.bh, self.wout, self.bout)
        self.counter = self.seq_length
        return out


# ------------------------- pure-JAX reference -------------------------

def _ref_embed_z(m, z):
    x = jax.nn.relu(z @ m.wz + m.bz[0])
    B, H = z.shape[0], m.hidden_dim
    h = jnp.zeros((B, H), jnp.float32)
    c = jnp.zeros((B, H), jnp.float32)
    xw = x @ m.wih + m.bg[0]
    outs = []
    for _ in range(m.seq_length):
        gates = xw + h @ m.whh
        i_g = jax.nn.sigmoid(gates[:, 0 * H:1 * H])
        f_g = jax.nn.sigmoid(gates[:, 1 * H:2 * H])
        g_g = jnp.tanh(gates[:, 2 * H:3 * H])
        o_g = jax.nn.sigmoid(gates[:, 3 * H:4 * H])
        c = f_g * c + i_g * g_g
        h = o_g * jnp.tanh(c)
        outs.append(h)
    return jnp.stack(outs, axis=0)        # time-major (T, B, H)


def _ref_forward(m, obs, ez, counter):
    obs_e = jax.nn.relu(obs @ m.wo + m.bo[0])
    x = obs_e + ez[counter]
    h1 = jax.nn.relu(x @ m.wh + m.bh[0])
    return h1 @ m.wout + m.bout[0]


# ------------------------- main -------------------------

if __name__ == "__main__":
    B, Z, OBS, OUT, T, H = 2, 16, 12, 6, 8, 32
    key = jax.random.PRNGKey(0)
    k_param, k_z, k_obs = jax.random.split(key, 3)

    model = StateConditionedDecoderPallas(
        z_dim=Z, out_dim=OUT, obs_dim=OBS, seq_length=T, hidden_dim=H,
        key=k_param)

    z = jax.random.normal(k_z, (B, Z), jnp.float32)
    model.reset_hidden_state(z)
    ez = model.func_embed_z(z)
    jax.block_until_ready(ez)

    ez_ref = _ref_embed_z(model, z)
    np.testing.assert_allclose(np.asarray(ez), np.asarray(ez_ref),
                               rtol=1e-5, atol=1e-5)

    # per-step forward (counter increments per call, as in the PyTorch module)
    obs_seq = jax.random.normal(k_obs, (T, B, OBS), jnp.float32)
    for step in range(3):
        counter_before = model.counter
        out = model.forward(obs_seq[step])
        jax.block_until_ready(out)
        out_ref = _ref_forward(model, obs_seq[step], ez_ref, counter_before)
        np.testing.assert_allclose(np.asarray(out), np.asarray(out_ref),
                                   rtol=1e-5, atol=1e-5)

    # fused rollout: all T decoder steps in one pallas_call (grid over steps)
    model.counter = 0
    outs = model.forward_rollout(obs_seq)
    jax.block_until_ready(outs)
    outs_ref = jnp.stack(
        [_ref_forward(model, obs_seq[t], ez_ref, t) for t in range(T)], axis=0)
    np.testing.assert_allclose(np.asarray(outs), np.asarray(outs_ref),
                               rtol=1e-5, atol=1e-5)

    print("KERNEL_OK")
</pallas_src>

<mosaic_0001>
module attributes {stable_mosaic.version = 11 : i64} {
  func.func @_embed_z_lstm_kernel(%arg0: memref<2x16xf32, #tpu.memory_space<vmem>>, %arg1: memref<16x32xf32, #tpu.memory_space<vmem>>, %arg2: memref<1x32xf32, #tpu.memory_space<vmem>>, %arg3: memref<32x128xf32, #tpu.memory_space<vmem>>, %arg4: memref<32x128xf32, #tpu.memory_space<vmem>>, %arg5: memref<1x128xf32, #tpu.memory_space<vmem>>, %arg6: memref<8x2x32xf32, #tpu.memory_space<vmem>>) attributes {dimension_semantics = [], scalar_prefetch = 0 : i64, scratch_operands = 0 : i64, tpu.core_type = #tpu.core_type<tc>} {
    %c0 = arith.constant 0 : index
    %c0_0 = arith.constant 0 : index
    %0 = vector.load %arg0[%c0, %c0_0] : memref<2x16xf32, #tpu.memory_space<vmem>>, vector<2x16xf32>
    %c0_1 = arith.constant 0 : index
    %c0_2 = arith.constant 0 : index
    %1 = vector.load %arg1[%c0_1, %c0_2] : memref<16x32xf32, #tpu.memory_space<vmem>>, vector<16x32xf32>
    %cst = arith.constant dense<0.000000e+00> : vector<2x32xf32>
    %2 = tpu.matmul %0, %1, %cst {dimension_numbers = #tpu.dot_dimension_numbers<[1], [0], [0], [1], [0, 0, 1, 1], [], []>} : vector<2x16xf32>, vector<16x32xf32>, vector<2x32xf32> -> vector<2x32xf32>
    %c0_3 = arith.constant 0 : index
    %c0_4 = arith.constant 0 : index
    %3 = vector.load %arg2[%c0_3, %c0_4] : memref<1x32xf32, #tpu.memory_space<vmem>>, vector<1x32xf32>
    %4 = vector.broadcast %3 : vector<1x32xf32> to vector<2x32xf32>
    %5 = arith.addf %2, %4 : vector<2x32xf32>
    %cst_5 = arith.constant 0.000000e+00 : f32
    %6 = vector.broadcast %cst_5 : f32 to vector<2x32xf32>
    %7 = arith.maximumf %5, %6 : vector<2x32xf32>
    %c0_6 = arith.constant 0 : index
    %c0_7 = arith.constant 0 : index
    %8 = vector.load %arg3[%c0_6, %c0_7] : memref<32x128xf32, #tpu.memory_space<vmem>>, vector<32x128xf32>
    %cst_8 = arith.constant dense<0.000000e+00> : vector<2x128xf32>
    %9 = tpu.matmul %7, %8, %cst_8 {dimension_numbers = #tpu.dot_dimension_numbers<[1], [0], [0], [1], [0, 0, 1, 1], [], []>} : vector<2x32xf32>, vector<32x128xf32>, vector<2x128xf32> -> vector<2x128xf32>
    %c0_9 = arith.constant 0 : index
    %c0_10 = arith.constant 0 : index
    %10 = vector.load %arg5[%c0_9, %c0_10] : memref<1x128xf32, #tpu.memory_space<vmem>>, vector<1x128xf32>
    %11 = vector.broadcast %10 : vector<1x128xf32> to vector<2x128xf32>
    %12 = arith.addf %9, %11 : vector<2x128xf32>
    %c0_11 = arith.constant 0 : index
    %c0_12 = arith.constant 0 : index
    %13 = vector.load %arg4[%c0_11, %c0_12] : memref<32x128xf32, #tpu.memory_space<vmem>>, vector<32x128xf32>
    %cst_13 = arith.constant 0.000000e+00 : f32
    %14 = vector.broadcast %cst_13 : f32 to vector<2x32xf32>
    %cst_14 = arith.constant 0.000000e+00 : f32
    %15 = vector.broadcast %cst_14 : f32 to vector<2x32xf32>
    %cst_15 = arith.constant dense<0.000000e+00> : vector<2x128xf32>
    %16 = tpu.matmul %14, %13, %cst_15 {dimension_numbers = #tpu.dot_dimension_numbers<[1], [0], [0], [1], [0, 0, 1, 1], [], []>} : vector<2x32xf32>, vector<32x128xf32>, vector<2x128xf32> -> vector<2x128xf32>
    %17 = arith.addf %12, %16 : vector<2x128xf32>
    %18 = vector.extract_strided_slice %17 {offsets = [0, 0], sizes = [2, 32], strides = [1, 1]} : vector<2x128xf32> to vector<2x32xf32>
    %19 = arith.negf %18 : vector<2x32xf32>
    %20 = math.exp %19 : vector<2x32xf32>
    %cst_16 = arith.constant 1.000000e+00 : f32
    %21 = vector.broadcast %cst_16 : f32 to vector<2x32xf32>
    %22 = arith.addf %21, %20 : vector<2x32xf32>
    %23 = arith.divf %21, %22 : vector<2x32xf32>
    %24 = vector.extract_strided_slice %17 {offsets = [0, 32], sizes = [2, 32], strides = [1, 1]} : vector<2x128xf32> to vector<2x32xf32>
    %25 = arith.negf %24 : vector<2x32xf32>
    %26 = math.exp %25 : vector<2x32xf32>
    %cst_17 = arith.constant 1.000000e+00 : f32
    %27 = vector.broadcast %cst_17 : f32 to vector<2x32xf32>
    %28 = arith.addf %27, %26 : vector<2x32xf32>
    %29 = arith.divf %27, %28 : vector<2x32xf32>
    %30 = vector.extract_strided_slice %17 {offsets = [0, 64], sizes = [2, 32], strides = [1, 1]} : vector<2x128xf32> to vector<2x32xf32>
    %31 = math.tanh %30 : vector<2x32xf32>
    %32 = vector.extract_strided_slice %17 {offsets = [0, 96], sizes = [2, 32], strides = [1, 1]} : vector<2x128xf32> to vector<2x32xf32>
    %33 = arith.negf %32 : vector<2x32xf32>
    %34 = math.exp %33 : vector<2x32xf32>
    %cst_18 = arith.constant 1.000000e+00 : f32
    %35 = vector.broadcast %cst_18 : f32 to vector<2x32xf32>
    %36 = arith.addf %35, %34 : vector<2x32xf32>
    %37 = arith.divf %35, %36 : vector<2x32xf32>
    %38 = arith.mulf %29, %15 : vector<2x32xf32>
    %39 = arith.mulf %23, %31 : vector<2x32xf32>
    %40 = arith.addf %38, %39 : vector<2x32xf32>
    %41 = math.tanh %40 : vector<2x32xf32>
    %42 = arith.mulf %37, %41 : vector<2x32xf32>
    %cst_19 = arith.constant dense<0.000000e+00> : vector<2x128xf32>
    %43 = tpu.matmul %42, %13, %cst_19 {dimension_numbers = #tpu.dot_dimension_numbers<[1], [0], [0], [1], [0, 0, 1, 1], [], []>} : vector<2x32xf32>, vector<32x128xf32>, vector<2x128xf32> -> vector<2x128xf32>
    %44 = arith.addf %12, %43 : vector<2x128xf32>
    %45 = vector.extract_strided_slice %44 {offsets = [0, 0], sizes = [2, 32], strides = [1, 1]} : vector<2x128xf32> to vector<2x32xf32>
    %46 = arith.negf %45 : vector<2x32xf32>
    %47 = math.exp %46 : vector<2x32xf32>
    %cst_20 = arith.constant 1.000000e+00 : f32
    %48 = vector.broadcast %cst_20 : f32 to vector<2x32xf32>
    %49 = arith.addf %48, %47 : vector<2x32xf32>
    %50 = arith.divf %48, %49 : vector<2x32xf32>
    %51 = vector.extract_strided_slice %44 {offsets = [0, 32], sizes = [2, 32], strides = [1, 1]} : vector<2x128xf32> to vector<2x32xf32>
    %52 = arith.negf %51 : vector<2x32xf32>
    %53 = math.exp %52 : vector<2x32xf32>
    %cst_21 = arith.constant 1.000000e+00 : f32
    %54 = vector.broadcast %cst_21 : f32 to vector<2x32xf32>
    %55 = arith.addf %54, %53 : vector<2x32xf32>
    %56 = arith.divf %54, %55 : vector<2x32xf32>
    %57 = vector.extract_strided_slice %44 {offsets = [0, 64], sizes = [2, 32], strides = [1, 1]} : vector<2x128xf32> to vector<2x32xf32>
    %58 = math.tanh %57 : vector<2x32xf32>
    %59 = vector.extract_strided_slice %44 {offsets = [0, 96], sizes = [2, 32], strides = [1, 1]} : vector<2x128xf32> to vector<2x32xf32>
    %60 = arith.negf %59 : vector<2x32xf32>
    %61 = math.exp %60 : vector<2x32xf32>
    %cst_22 = arith.constant 1.000000e+00 : f32
    %62 = vector.broadcast %cst_22 : f32 to vector<2x32xf32>
    %63 = arith.addf %62, %61 : vector<2x32xf32>
    %64 = arith.divf %62, %63 : vector<2x32xf32>
    %65 = arith.mulf %56, %40 : vector<2x32xf32>
    %66 = arith.mulf %50, %58 : vector<2x32xf32>
    %67 = arith.addf %65, %66 : vector<2x32xf32>
    %68 = math.tanh %67 : vector<2x32xf32>
    %69 = arith.mulf %64, %68 : vector<2x32xf32>
    %cst_23 = arith.constant dense<0.000000e+00> : vector<2x128xf32>
    %70 = tpu.matmul %69, %13, %cst_23 {dimension_numbers = #tpu.dot_dimension_numbers<[1], [0], [0], [1], [0, 0, 1, 1], [], []>} : vector<2x32xf32>, vector<32x128xf32>, vector<2x128xf32> -> vector<2x128xf32>
    %71 = arith.addf %12, %70 : vector<2x128xf32>
    %72 = vector.extract_strided_slice %71 {offsets = [0, 0], sizes = [2, 32], strides = [1, 1]} : vector<2x128xf32> to vector<2x32xf32>
    %73 = arith.negf %72 : vector<2x32xf32>
    %74 = math.exp %73 : vector<2x32xf32>
    %cst_24 = arith.constant 1.000000e+00 : f32
    %75 = vector.broadcast %cst_24 : f32 to vector<2x32xf32>
    %76 = arith.addf %75, %74 : vector<2x32xf32>
    %77 = arith.divf %75, %76 : vector<2x32xf32>
    %78 = vector.extract_strided_slice %71 {offsets = [0, 32], sizes = [2, 32], strides = [1, 1]} : vector<2x128xf32> to vector<2x32xf32>
    %79 = arith.negf %78 : vector<2x32xf32>
    %80 = math.exp %79 : vector<2x32xf32>
    %cst_25 = arith.constant 1.000000e+00 : f32
    %81 = vector.broadcast %cst_25 : f32 to vector<2x32xf32>
    %82 = arith.addf %81, %80 : vector<2x32xf32>
    %83 = arith.divf %81, %82 : vector<2x32xf32>
    %84 = vector.extract_strided_slice %71 {offsets = [0, 64], sizes = [2, 32], strides = [1, 1]} : vector<2x128xf32> to vector<2x32xf32>
    %85 = math.tanh %84 : vector<2x32xf32>
    %86 = vector.extract_strided_slice %71 {offsets = [0, 96], sizes = [2, 32], strides = [1, 1]} : vector<2x128xf32> to vector<2x32xf32>
    %87 = arith.negf %86 : vector<2x32xf32>
    %88 = math.exp %87 : vector<2x32xf32>
    %cst_26 = arith.constant 1.000000e+00 : f32
    %89 = vector.broadcast %cst_26 : f32 to vector<2x32xf32>
    %90 = arith.addf %89, %88 : vector<2x32xf32>
    %91 = arith.divf %89, %90 : vector<2x32xf32>
    %92 = arith.mulf %83, %67 : vector<2x32xf32>
    %93 = arith.mulf %77, %85 : vector<2x32xf32>
    %94 = arith.addf %92, %93 : vector<2x32xf32>
    %95 = math.tanh %94 : vector<2x32xf32>
    %96 = arith.mulf %91, %95 : vector<2x32xf32>
    %cst_27 = arith.constant dense<0.000000e+00> : vector<2x128xf32>
    %97 = tpu.matmul %96, %13, %cst_27 {dimension_numbers = #tpu.dot_dimension_numbers<[1], [0], [0], [1], [0, 0, 1, 1], [], []>} : vector<2x32xf32>, vector<32x128xf32>, vector<2x128xf32> -> vector<2x128xf32>
    %98 = arith.addf %12, %97 : vector<2x128xf32>
    %99 = vector.extract_strided_slice %98 {offsets = [0, 0], sizes = [2, 32], strides = [1, 1]} : vector<2x128xf32> to vector<2x32xf32>
    %100 = arith.negf %99 : vector<2x32xf32>
    %101 = math.exp %100 : vector<2x32xf32>
    %cst_28 = arith.constant 1.000000e+00 : f32
    %102 = vector.broadcast %cst_28 : f32 to vector<2x32xf32>
    %103 = arith.addf %102, %101 : vector<2x32xf32>
    %104 = arith.divf %102, %103 : vector<2x32xf32>
    %105 = vector.extract_strided_slice %98 {offsets = [0, 32], sizes = [2, 32], strides = [1, 1]} : vector<2x128xf32> to vector<2x32xf32>
    %106 = arith.negf %105 : vector<2x32xf32>
    %107 = math.exp %106 : vector<2x32xf32>
    %cst_29 = arith.constant 1.000000e+00 : f32
    %108 = vector.broadcast %cst_29 : f32 to vector<2x32xf32>
    %109 = arith.addf %108, %107 : vector<2x32xf32>
    %110 = arith.divf %108, %109 : vector<2x32xf32>
    %111 = vector.extract_strided_slice %98 {offsets = [0, 64], sizes = [2, 32], strides = [1, 1]} : vector<2x128xf32> to vector<2x32xf32>
    %112 = math.tanh %111 : vector<2x32xf32>
    %113 = vector.extract_strided_slice %98 {offsets = [0, 96], sizes = [2, 32], strides = [1, 1]} : vector<2x128xf32> to vector<2x32xf32>
    %114 = arith.negf %113 : vector<2x32xf32>
    %115 = math.exp %114 : vector<2x32xf32>
    %cst_30 = arith.constant 1.000000e+00 : f32
    %116 = vector.broadcast %cst_30 : f32 to vector<2x32xf32>
    %117 = arith.addf %116, %115 : vector<2x32xf32>
    %118 = arith.divf %116, %117 : vector<2x32xf32>
    %119 = arith.mulf %110, %94 : vector<2x32xf32>
    %120 = arith.mulf %104, %112 : vector<2x32xf32>
    %121 = arith.addf %119, %120 : vector<2x32xf32>
    %122 = math.tanh %121 : vector<2x32xf32>
    %123 = arith.mulf %118, %122 : vector<2x32xf32>
    %cst_31 = arith.constant dense<0.000000e+00> : vector<2x128xf32>
    %124 = tpu.matmul %123, %13, %cst_31 {dimension_numbers = #tpu.dot_dimension_numbers<[1], [0], [0], [1], [0, 0, 1, 1], [], []>} : vector<2x32xf32>, vector<32x128xf32>, vector<2x128xf32> -> vector<2x128xf32>
    %125 = arith.addf %12, %124 : vector<2x128xf32>
    %126 = vector.extract_strided_slice %125 {offsets = [0, 0], sizes = [2, 32], strides = [1, 1]} : vector<2x128xf32> to vector<2x32xf32>
    %127 = arith.negf %126 : vector<2x32xf32>
    %128 = math.exp %127 : vector<2x32xf32>
    %cst_32 = arith.constant 1.000000e+00 : f32
    %129 = vector.broadcast %cst_32 : f32 to vector<2x32xf32>
    %130 = arith.addf %129, %128 : vector<2x32xf32>
    %131 = arith.divf %129, %130 : vector<2x32xf32>
    %132 = vector.extract_strided_slice %125 {offsets = [0, 32], sizes = [2, 32], strides = [1, 1]} : vector<2x128xf32> to vector<2x32xf32>
    %133 = arith.negf %132 : vector<2x32xf32>
    %134 = math.exp %133 : vector<2x32xf32>
    %cst_33 = arith.constant 1.000000e+00 : f32
    %135 = vector.broadcast %cst_33 : f32 to vector<2x32xf32>
    %136 = arith.addf %135, %134 : vector<2x32xf32>
    %137 = arith.divf %135, %136 : vector<2x32xf32>
    %138 = vector.extract_strided_slice %125 {offsets = [0, 64], sizes = [2, 32], strides = [1, 1]} : vector<2x128xf32> to vector<2x32xf32>
    %139 = math.tanh %138 : vector<2x32xf32>
    %140 = vector.extract_strided_slice %125 {offsets = [0, 96], sizes = [2, 32], strides = [1, 1]} : vector<2x128xf32> to vector<2x32xf32>
    %141 = arith.negf %140 : vector<2x32xf32>
    %142 = math.exp %141 : vector<2x32xf32>
    %cst_34 = arith.constant 1.000000e+00 : f32
    %143 = vector.broadcast %cst_34 : f32 to vector<2x32xf32>
    %144 = arith.addf %143, %142 : vector<2x32xf32>
    %145 = arith.divf %143, %144 : vector<2x32xf32>
    %146 = arith.mulf %137, %121 : vector<2x32xf32>
    %147 = arith.mulf %131, %139 : vector<2x32xf32>
    %148 = arith.addf %146, %147 : vector<2x32xf32>
    %149 = math.tanh %148 : vector<2x32xf32>
    %150 = arith.mulf %145, %149 : vector<2x32xf32>
    %cst_35 = arith.constant dense<0.000000e+00> : vector<2x128xf32>
    %151 = tpu.matmul %150, %13, %cst_35 {dimension_numbers = #tpu.dot_dimension_numbers<[1], [0], [0], [1], [0, 0, 1, 1], [], []>} : vector<2x32xf32>, vector<32x128xf32>, vector<2x128xf32> -> vector<2x128xf32>
    %152 = arith.addf %12, %151 : vector<2x128xf32>
    %153 = vector.extract_strided_slice %152 {offsets = [0, 0], sizes = [2, 32], strides = [1, 1]} : vector<2x128xf32> to vector<2x32xf32>
    %154 = arith.negf %153 : vector<2x32xf32>
    %155 = math.exp %154 : vector<2x32xf32>
    %cst_36 = arith.constant 1.000000e+00 : f32
    %156 = vector.broadcast %cst_36 : f32 to vector<2x32xf32>
    %157 = arith.addf %156, %155 : vector<2x32xf32>
    %158 = arith.divf %156, %157 : vector<2x32xf32>
    %159 = vector.extract_strided_slice %152 {offsets = [0, 32], sizes = [2, 32], strides = [1, 1]} : vector<2x128xf32> to vector<2x32xf32>
    %160 = arith.negf %159 : vector<2x32xf32>
    %161 = math.exp %160 : vector<2x32xf32>
    %cst_37 = arith.constant 1.000000e+00 : f32
    %162 = vector.broadcast %cst_37 : f32 to vector<2x32xf32>
    %163 = arith.addf %162, %161 : vector<2x32xf32>
    %164 = arith.divf %162, %163 : vector<2x32xf32>
    %165 = vector.extract_strided_slice %152 {offsets = [0, 64], sizes = [2, 32], strides = [1, 1]} : vector<2x128xf32> to vector<2x32xf32>
    %166 = math.tanh %165 : vector<2x32xf32>
    %167 = vector.extract_strided_slice %152 {offsets = [0, 96], sizes = [2, 32], strides = [1, 1]} : vector<2x128xf32> to vector<2x32xf32>
    %168 = arith.negf %167 : vector<2x32xf32>
    %169 = math.exp %168 : vector<2x32xf32>
    %cst_38 = arith.constant 1.000000e+00 : f32
    %170 = vector.broadcast %cst_38 : f32 to vector<2x32xf32>
    %171 = arith.addf %170, %169 : vector<2x32xf32>
    %172 = arith.divf %170, %171 : vector<2x32xf32>
    %173 = arith.mulf %164, %148 : vector<2x32xf32>
    %174 = arith.mulf %158, %166 : vector<2x32xf32>
    %175 = arith.addf %173, %174 : vector<2x32xf32>
    %176 = math.tanh %175 : vector<2x32xf32>
    %177 = arith.mulf %172, %176 : vector<2x32xf32>
    %cst_39 = arith.constant dense<0.000000e+00> : vector<2x128xf32>
    %178 = tpu.matmul %177, %13, %cst_39 {dimension_numbers = #tpu.dot_dimension_numbers<[1], [0], [0], [1], [0, 0, 1, 1], [], []>} : vector<2x32xf32>, vector<32x128xf32>, vector<2x128xf32> -> vector<2x128xf32>
    %179 = arith.addf %12, %178 : vector<2x128xf32>
    %180 = vector.extract_strided_slice %179 {offsets = [0, 0], sizes = [2, 32], strides = [1, 1]} : vector<2x128xf32> to vector<2x32xf32>
    %181 = arith.negf %180 : vector<2x32xf32>
    %182 = math.exp %181 : vector<2x32xf32>
    %cst_40 = arith.constant 1.000000e+00 : f32
    %183 = vector.broadcast %cst_40 : f32 to vector<2x32xf32>
    %184 = arith.addf %183, %182 : vector<2x32xf32>
    %185 = arith.divf %183, %184 : vector<2x32xf32>
    %186 = vector.extract_strided_slice %179 {offsets = [0, 32], sizes = [2, 32], strides = [1, 1]} : vector<2x128xf32> to vector<2x32xf32>
    %187 = arith.negf %186 : vector<2x32xf32>
    %188 = math.exp %187 : vector<2x32xf32>
    %cst_41 = arith.constant 1.000000e+00 : f32
    %189 = vector.broadcast %cst_41 : f32 to vector<2x32xf32>
    %190 = arith.addf %189, %188 : vector<2x32xf32>
    %191 = arith.divf %189, %190 : vector<2x32xf32>
    %192 = vector.extract_strided_slice %179 {offsets = [0, 64], sizes = [2, 32], strides = [1, 1]} : vector<2x128xf32> to vector<2x32xf32>
    %193 = math.tanh %192 : vector<2x32xf32>
    %194 = vector.extract_strided_slice %179 {offsets = [0, 96], sizes = [2, 32], strides = [1, 1]} : vector<2x128xf32> to vector<2x32xf32>
    %195 = arith.negf %194 : vector<2x32xf32>
    %196 = math.exp %195 : vector<2x32xf32>
    %cst_42 = arith.constant 1.000000e+00 : f32
    %197 = vector.broadcast %cst_42 : f32 to vector<2x32xf32>
    %198 = arith.addf %197, %196 : vector<2x32xf32>
    %199 = arith.divf %197, %198 : vector<2x32xf32>
    %200 = arith.mulf %191, %175 : vector<2x32xf32>
    %201 = arith.mulf %185, %193 : vector<2x32xf32>
    %202 = arith.addf %200, %201 : vector<2x32xf32>
    %203 = math.tanh %202 : vector<2x32xf32>
    %204 = arith.mulf %199, %203 : vector<2x32xf32>
    %cst_43 = arith.constant dense<0.000000e+00> : vector<2x128xf32>
    %205 = tpu.matmul %204, %13, %cst_43 {dimension_numbers = #tpu.dot_dimension_numbers<[1], [0], [0], [1], [0, 0, 1, 1], [], []>} : vector<2x32xf32>, vector<32x128xf32>, vector<2x128xf32> -> vector<2x128xf32>
    %206 = arith.addf %12, %205 : vector<2x128xf32>
    %207 = vector.extract_strided_slice %206 {offsets = [0, 0], sizes = [2, 32], strides = [1, 1]} : vector<2x128xf32> to vector<2x32xf32>
    %208 = arith.negf %207 : vector<2x32xf32>
    %209 = math.exp %208 : vector<2x32xf32>
    %cst_44 = arith.constant 1.000000e+00 : f32
    %210 = vector.broadcast %cst_44 : f32 to vector<2x32xf32>
    %211 = arith.addf %210, %209 : vector<2x32xf32>
    %212 = arith.divf %210, %211 : vector<2x32xf32>
    %213 = vector.extract_strided_slice %206 {offsets = [0, 32], sizes = [2, 32], strides = [1, 1]} : vector<2x128xf32> to vector<2x32xf32>
    %214 = arith.negf %213 : vector<2x32xf32>
    %215 = math.exp %214 : vector<2x32xf32>
    %cst_45 = arith.constant 1.000000e+00 : f32
    %216 = vector.broadcast %cst_45 : f32 to vector<2x32xf32>
    %217 = arith.addf %216, %215 : vector<2x32xf32>
    %218 = arith.divf %216, %217 : vector<2x32xf32>
    %219 = vector.extract_strided_slice %206 {offsets = [0, 64], sizes = [2, 32], strides = [1, 1]} : vector<2x128xf32> to vector<2x32xf32>
    %220 = math.tanh %219 : vector<2x32xf32>
    %221 = vector.extract_strided_slice %206 {offsets = [0, 96], sizes = [2, 32], strides = [1, 1]} : vector<2x128xf32> to vector<2x32xf32>
    %222 = arith.negf %221 : vector<2x32xf32>
    %223 = math.exp %222 : vector<2x32xf32>
    %cst_46 = arith.constant 1.000000e+00 : f32
    %224 = vector.broadcast %cst_46 : f32 to vector<2x32xf32>
    %225 = arith.addf %224, %223 : vector<2x32xf32>
    %226 = arith.divf %224, %225 : vector<2x32xf32>
    %227 = arith.mulf %218, %202 : vector<2x32xf32>
    %228 = arith.mulf %212, %220 : vector<2x32xf32>
    %229 = arith.addf %227, %228 : vector<2x32xf32>
    %230 = math.tanh %229 : vector<2x32xf32>
    %231 = arith.mulf %226, %230 : vector<2x32xf32>
    %232 = vector.shape_cast %42 : vector<2x32xf32> to vector<1x2x32xf32>
    %233 = vector.shape_cast %69 : vector<2x32xf32> to vector<1x2x32xf32>
    %234 = vector.shape_cast %96 : vector<2x32xf32> to vector<1x2x32xf32>
    %235 = vector.shape_cast %123 : vector<2x32xf32> to vector<1x2x32xf32>
    %236 = vector.shape_cast %150 : vector<2x32xf32> to vector<1x2x32xf32>
    %237 = vector.shape_cast %177 : vector<2x32xf32> to vector<1x2x32xf32>
    %238 = vector.shape_cast %204 : vector<2x32xf32> to vector<1x2x32xf32>
    %239 = vector.shape_cast %231 : vector<2x32xf32> to vector<1x2x32xf32>
    %240 = tpu.concatenate %232, %233, %234, %235, %236, %237, %238, %239 in 0 : vector<1x2x32xf32>, vector<1x2x32xf32>, vector<1x2x32xf32>, vector<1x2x32xf32>, vector<1x2x32xf32>, vector<1x2x32xf32>, vector<1x2x32xf32>, vector<1x2x32xf32> -> vector<8x2x32xf32>
    %c0_47 = arith.constant 0 : index
    %c0_48 = arith.constant 0 : index
    %c0_49 = arith.constant 0 : index
    %241 = vector.load %arg6[%c0_47, %c0_48, %c0_49] : memref<8x2x32xf32, #tpu.memory_space<vmem>>, vector<8x2x32xf32>
    tpu.vector_store %arg6[%c0_47, %c0_48, %c0_49], %240 {strides = array<i32>} : memref<8x2x32xf32, #tpu.memory_space<vmem>>, vector<8x2x32xf32>,
    return
  }
}

</mosaic_0001>

<bundles_post_ra>
// kernel: _embed_impl.1
= control target key start
LH: loop header
LB: loop body
LE: loop exit
PB: predicated region body
PF: predicated region fallthrough
CT: control target
= control target key end

     0   :  { %11 = vsyncpa [#allocation3], 0  ;;  %s1681_s0 = inlined_call_operand.hbm [shape: f32[2,16], index: 0, kind: input, shape index: {}]   ;;  %s1682_s1 = inlined_call_operand.hbm [shape: f32[16,32], index: 1, kind: input, shape index: {}]   ;;  %s1683_s2 = inlined_call_operand.vmem [shape: f32[1,32], index: 2, kind: input, shape index: {}]   ;;  %s1684_s3 = inlined_call_operand.hbm [shape: f32[32,128], index: 3, kind: input, shape index: {}]   ;;  %s1685_s4 = inlined_call_operand.hbm [shape: f32[32,128], index: 4, kind: input, shape index: {}]   ;;  %s1686_s5 = inlined_call_operand.vmem [shape: f32[1,128], index: 5, kind: input, shape index: {}]   ;;  %s1687_s6 = inlined_call_operand.hbm [shape: f32[8,2,32], index: 6, kind: output, shape index: {}]  }
   0x1   :  { %12 = vsyncpa [#allocation6], 0 }
   0x2   :  { %13 = vsyncpa [#allocation9], 0 }
   0x3   :  { %14 = vsyncpa [#allocation4], 0  ;;  %s1445_s21 = smov [#allocation5]  }
   0x4   :  { %s30_s22 = sshll.u32 %s1445_s21, 4  ;;  %s31_s22 = int_to_ptr.vmem [resolvable:$true] %s30_s22 }
   0x5   :  { %s1345_s23 = scalar_lea.vmem %s31_s22, 256  ;;  %p1350_p1 = scmp.lt.s32.totalorder %s31_s22, %s31_s22 }
   0x6   :  { %p1346_p0 = scmp.ne.s32.totalorder %s31_s22, %s1345_s23  ;;  %p1351_p2 = scmp.lt.s32.totalorder %s1345_s23, %s1345_s23 }
   0x8   :  { %p1352_p3 = por %p1351_p2, %p1350_p1 }
   0xa   :  { %p1353_p4 = pnand %p1352_p3, %p1346_p0 }
   0xc   :  { %1356 = shalt.err (!%p1353_p4)
}
   0xd   :  { %s1446_s24 = smov 128   ;;  %s1447_s25 = smov 8  }
   0xe   :  { %36 = dma.hbm_to_vmem [thread:$0]  %s1682_s1, 256, %s31_s22, [#allocation6], %s1446_s24, %s1446_s24, %s1447_s25  }
   0xf   :  { %s1448_s28 = smov [#allocation2]   ;;  %s1449_s30 = smov [#allocation7]  }
  0x10   :  { %s21_s29 = sshll.u32 %s1448_s28, 4  ;;  %s44_s7 = sshll.u32 %s1449_s30, 4  ;;  %s22_s29 = int_to_ptr.vmem [resolvable:$true] %s21_s29  ;;  %s45_s7 = int_to_ptr.vmem [resolvable:$true] %s44_s7 }
  0x11   :  { %s1365_s8 = scalar_lea.vmem %s22_s29, 32  ;;  %p1370_p6 = scmp.lt.s32.totalorder %s22_s29, %s22_s29 }
  0x12   :  { %p1366_p5 = scmp.ne.s32.totalorder %s22_s29, %s1365_s8  ;;  %p1371_p7 = scmp.lt.s32.totalorder %s1365_s8, %s1365_s8 }
  0x14   :  { %p1372_p8 = por %p1371_p7, %p1370_p6 }
  0x16   :  { %p1373_p9 = pnand %p1372_p8, %p1366_p5 }
  0x18   :  { %1376 = shalt.err (!%p1373_p9)
}
  0x19   :  { %24 = dma.hbm_to_vmem [thread:$0]  %s1681_s0, 32, %s22_s29, [#allocation3]  }
  0x1a   :  { %s1385_s11 = scalar_lea.vmem %s45_s7, 512  ;;  %p1390_p11 = scmp.lt.s32.totalorder %s45_s7, %s45_s7 }
  0x1b   :  { %p1386_p10 = scmp.ne.s32.totalorder %s45_s7, %s1385_s11  ;;  %p1391_p12 = scmp.lt.s32.totalorder %s1385_s11, %s1385_s11 }
  0x1d   :  { %p1392_p13 = por %p1391_p12, %p1390_p11 }
  0x1f   :  { %p1393_p0 = pnand %p1392_p13, %p1386_p10 }
  0x21   :  { %1396 = shalt.err (!%p1393_p0)
}
  0x22   :  { %50 = dma.hbm_to_vmem [thread:$0]  %s1684_s3, 512, %s45_s7, [#allocation6], %s1446_s24, %s1446_s24, %s1447_s25  }
  0x23   :  { %s1450_s13 = smov [#allocation8]  }
  0x24   :  { %s56_s14 = sshll.u32 %s1450_s13, 4  ;;  %s57_s14 = int_to_ptr.vmem [resolvable:$true] %s56_s14 }
  0x25   :  { %s1405_s15 = scalar_lea.vmem %s57_s14, 512  ;;  %p1410_p2 = scmp.lt.s32.totalorder %s57_s14, %s57_s14 }
  0x26   :  { %p1406_p1 = scmp.ne.s32.totalorder %s57_s14, %s1405_s15  ;;  %p1411_p3 = scmp.lt.s32.totalorder %s1405_s15, %s1405_s15 }
  0x28   :  { %p1412_p4 = por %p1411_p3, %p1410_p2 }
  0x2a   :  { %p1413_p5 = pnand %p1412_p4, %p1406_p1 }
  0x2c   :  { %1416 = shalt.err (!%p1413_p5)
}
  0x2d   :  { %62 = dma.hbm_to_vmem [thread:$0]  %s1685_s4, 512, %s57_s14, [#allocation9], %s1446_s24, %s1446_s24, %s1447_s25  }
  0x2e   :  { %1437 = dma.done.wait [#allocation3], 32  }
  0x2f   :  { %1438 = vsyncadd [#allocation3], 4294967264 }
  0x30   :  { %1439 = dma.done.wait [#allocation6], 768  }
  0x31   :  { %1440 = vsyncadd [#allocation6], 4294966528 }
  0x32   :  { %1441 = dma.done.wait [#allocation9], 512  }
  0x33   :  { %1442 = vsyncadd [#allocation9], 4294966784  ;;  %v1451_v0 = vmov 0.0   ;;  %vm1452_vm0 = vmmov 0   ;;  %v79_v1 = vld [vmem:[#allocation5 + $0x8] sm:$0xff]  ;;  %v78_v2 = vld [vmem:[#allocation5] sm:$0xff] }
  0x34   :  { %1155 = vmatprep.subr.mxu0 %v1451_v0  ;;  %1159 = vmatprep.mubr.msk.f32.mxu0 %vm1452_vm0, %v1451_v0  ;;  %v77_v3 = vld [vmem:[#allocation2] sm:$0x3]  ;;  %vm87_vm1 = vcmask 130048   ;;  %v165_v4 = vld [vmem:[#allocation7 + $0x18] sm:$0xff]  ;;  %v164_v6 = vld [vmem:[#allocation7 + $0x10] sm:$0xff]  ;;  %vm173_vm2 = vcmask 261120  }
  0x35   :  { %1162 = vmatprep.subr.mxu1 %v1451_v0  ;;  %1170 = vmatprep.mubr.msk.f32.mxu1 %vm1452_vm0, %v1451_v0  ;;  %v1520_v5 = vld [vmem:[#allocation8 + $0x18] sm:$0xff]  ;;  %v1528_v7 = vld [vmem:[#allocation8 + $0x10] sm:$0xff]  ;;  %v163_v8 = vld [vmem:[#allocation7 + $0x8] sm:$0xff]  ;;  %s1453_s18 = smov 64   ;;  %vm1060_vm3 = vcmask 254976   ;;  %s1455_s19 = smov [#allocation10]  }
  0x36   :  { %1156 = vmatpush3.msra.mxu0 %v79_v1  ;;  %1163 = vmatpush3.msra.mxu1 %v165_v4  ;;  %v1533_v9 = vld [vmem:[#allocation8 + $0x8] sm:$0xff]  ;;  %v162_v10 = vld [vmem:[#allocation7] sm:$0xff]  ;;  %s1074_s20 = sshll.u32 %s1455_s19, 4  ;;  %s1075_s20 = int_to_ptr.vmem [resolvable:$true] %s1074_s20 }
  0x37   :  { %1157 = vmatprep.subr.mxu0 %v1451_v0  ;;  %1164 = vmatprep.subr.mxu1 %v1451_v0  ;;  %v1538_v11 = vld [vmem:[#allocation8] sm:$0xff]  ;;  %v1088_v12 = vld [vmem:[%s1683_s2] ss:$0 sm:$0xff]  ;;  %s1417_s21 = scalar_lea.vmem %s1075_s20, 256  ;;  %p1422_p7 = scmp.lt.s32.totalorder %s1075_s20, %s1075_s20 }
  0x38   :  { %1158 = vmatpush3.msra.mxu0 %v78_v2  ;;  %1165 = vmatpush3.msra.mxu1 %v164_v6  ;;  %v1090_v19 = vld [vmem:[%s1686_s5] ss:$0 sm:$0xff]  ;;  %s1454_s5 = smov 32   ;;  %p1418_p6 = scmp.ne.s32.totalorder %s1075_s20, %s1417_s21 }
  0x39   :  { %1160 = vmatmul.mubr.msk.f32.vlgmr.msra.gmra.mxu0 %vm87_vm1, %v77_v3  ;;  %1173 = vmatprep.subr.mxu0 %v1451_v0  ;;  %p1423_p8 = scmp.lt.s32.totalorder %s1417_s21, %s1417_s21 }
  0x3a   :  { %1174 = vmatpush3.msra.mxu0 %v1520_v5  ;;  %1181 = vmatprep.mubr.msk.f32.mxu0 %vm1452_vm0, %v1451_v0 }
  0x3b   :  { %1175 = vmatprep.subr.mxu0 %v1451_v0  ;;  %1166 = vmatprep.subr.mxu1 %v1451_v0  ;;  %p1424_p9 = por %p1423_p8, %p1422_p7 }
  0x3c   :  { %1176 = vmatpush3.msra.mxu0 %v1528_v7  ;;  %1167 = vmatpush3.msra.mxu1 %v163_v8 }
  0x3d   :  { %1177 = vmatprep.subr.mxu0 %v1451_v0  ;;  %1168 = vmatprep.subr.mxu1 %v1451_v0  ;;  %p1425_p10 = pnand %p1424_p9, %p1418_p6 }
  0x3e   :  { %1178 = vmatpush3.msra.mxu0 %v1533_v9  ;;  %1169 = vmatpush3.msra.mxu1 %v162_v10 }
  0x3f   :  { %1179 = vmatprep.subr.mxu0 %v1451_v0  ;;  %1184 = vmatprep.subr.mxu1 %v1451_v0 }
  0x40   :  { %1180 = vmatpush3.msra.mxu0 %v1538_v11 }
  0x41   :  { %1182 = vmatmul.mubr.f32.vlgmr.msra.gmra.mxu0 %v1451_v0  ;;  %1195 = vmatprep.subr.mxu0 %v1451_v0 }
  0x42   :  { %1203 = vmatprep.mubr.msk.f32.mxu0 %vm1452_vm0, %v1451_v0  ;;  %1196 = vmatpush3.msra.mxu0 %v1520_v5 }
  0x43   :  { %1197 = vmatprep.subr.mxu0 %v1451_v0 }
  0x44   :  { %1198 = vmatpush3.msra.mxu0 %v1528_v7 }
  0x45   :  { %1199 = vmatprep.subr.mxu0 %v1451_v0 }
  0x46   :  { %1200 = vmatpush3.msra.mxu0 %v1533_v9 }
  0x47   :  { %1201 = vmatprep.subr.mxu0 %v1451_v0 }
  0x48   :  { %1202 = vmatpush3.msra.mxu0 %v1538_v11 }
  0x49   :  { %1217 = vmatprep.subr.mxu0 %v1451_v0 }
  0xf9   :  { %v157_v13 = vpop.f32.mrf.mxu0 }
  0xfa   :  { %v158_v14 = vadd.f32 %v1088_v12, %v157_v13 }
  0xfb   :  { %v1161_v15 = vpop.f32.mrf.mxu0 }
  0xfc   :  { %v161_v16 = vmax.f32 %v158_v14, 0.0 }
  0xfe   :  { %1171 = vmatmul.mubr.msk.f32.vlgmr.msra.gmra.mxu1 %vm173_vm2, %v161_v16 }
  0xff   :  { %1185 = vmatpush3.msra.mxu1 %v1520_v5  ;;  %1192 = vmatprep.mubr.msk.f32.mxu1 %vm1452_vm0, %v1451_v0 }
 0x100   :  { %1186 = vmatprep.subr.mxu1 %v1451_v0 }
 0x101   :  { %1187 = vmatpush3.msra.mxu1 %v1528_v7  ;;  %v320_v17 = vpop.f32.mrf.mxu0 }
 0x102   :  { %1188 = vmatprep.subr.mxu1 %v1451_v0 }
 0x103   :  { %1189 = vmatpush3.msra.mxu1 %v1533_v9  ;;  %v1183_v18 = vpop.f32.mrf.mxu0 }
 0x104   :  { %1190 = vmatprep.subr.mxu1 %v1451_v0 }
 0x105   :  { %1191 = vmatpush3.msra.mxu1 %v1538_v11 }
 0x106   :  { %1206 = vmatprep.subr.mxu1 %v1451_v0 }
 0x1be   :  { %v243_v20 = vpop.f32.mrf.mxu1 }
 0x1bf   :  { %v1571_v21 = vadd.f32 %v1090_v19, %v243_v20 }
 0x1c0   :  { %v1172_v22 = vpop.f32.mrf.mxu1 }
 0x1c1   :  { %v324_v23 = vadd.f32 %v320_v17, %v1571_v21 }
 0x1c3   :  { %1273 = vtanh.f32 %v324_v23  ;;  %v1092_v25 = vmul.f32 -1.442695, %v324_v23 }
 0x1c5   :  { %1275 = vpow2.f32 %v1092_v25 }
 0x1d0   :  { %v1274_v24 = vpop.eup %1273 }
 0x1d1   :  { %334 = vrot.lane.b32.xlu0 %v1274_v24, %s1453_s18 }
 0x1d2   :  { %v1276_v26 = vpop.eup %1275 }
 0x1d3   :  { %v328_v27 = vadd.f32 1.0, %v1276_v26 }
 0x1d5   :  { %1277 = vrcp.f32 %v328_v27 }
 0x1e2   :  { %v1278_v28 = vpop.eup %1277 }
 0x1e3   :  { %v332_v31 = vmul.f32 0.0, %v1278_v28 }
 0x243   :  { %v335_v29 = vpop.permute.xlu0 %334 }
 0x244   :  { %v337_v30 = vmul.f32 %v1278_v28, %v335_v29 }
 0x246   :  { %339 = vrot.lane.b32.xlu0 %v337_v30, %s1454_s5 }
 0x2b8   :  { %v340_v32 = vpop.permute.xlu0 %339 }
 0x2b9   :  { %v342_v33 = vadd.f32 %v340_v32, %v332_v31 }
 0x2bb   :  { %1279 = vtanh.f32 %v342_v33 }
 0x2c8   :  { %v1280_v34 = vpop.eup %1279 }
 0x2c9   :  { %345 = vrot.lane.b32.xlu1 %v1280_v34, %s1453_s18 }
 0x33b   :  { %v346_v35 = vpop.permute.xlu1 %345 }
 0x33c   :  { %v348_v36 = vmul.f32 %v1278_v28, %v346_v35 }
 0x33e   :  { %350 = vrot.lane.b32.xlu1 %v348_v36, %s1454_s5 }
 0x3b0   :  { %v351_v37 = vpop.permute.xlu1 %350 }
 0x3b1   :  { %1061 = vst.msk [vmem:[#allocation10] sm:$0x3] %vm1060_vm3, %v351_v37  ;;  %1193 = vmatmul.mubr.msk.f32.vlgmr.msra.gmra.mxu1 %vm173_vm2, %v351_v37 }
 0x3b2   :  { %1207 = vmatpush3.msra.mxu1 %v1520_v5  ;;  %1214 = vmatprep.mubr.msk.f32.mxu1 %vm1452_vm0, %v1451_v0 }
 0x3b3   :  { %1208 = vmatprep.subr.mxu1 %v1451_v0 }
 0x3b4   :  { %1209 = vmatpush3.msra.mxu1 %v1528_v7 }
 0x3b5   :  { %1210 = vmatprep.subr.mxu1 %v1451_v0 }
 0x3b6   :  { %1211 = vmatpush3.msra.mxu1 %v1533_v9 }
 0x3b7   :  { %1212 = vmatprep.subr.mxu1 %v1451_v0 }
 0x3b8   :  { %1213 = vmatpush3.msra.mxu1 %v1538_v11 }
 0x3b9   :  { %1228 = vmatprep.subr.mxu1 %v1451_v0 }
 0x471   :  { %v420_v38 = vpop.f32.mrf.mxu1 }
 0x472   :  { %v424_v39 = vadd.f32 %v420_v38, %v1571_v21 }
 0x473   :  { %v1194_v40 = vpop.f32.mrf.mxu1 }
 0x474   :  { %1281 = vtanh.f32 %v424_v39  ;;  %v1094_v42 = vmul.f32 -1.442695, %v424_v39 }
 0x476   :  { %1283 = vpow2.f32 %v1094_v42 }
 0x481   :  { %v1282_v41 = vpop.eup %1281 }
 0x482   :  { %434 = vrot.lane.b32.xlu0 %v1282_v41, %s1453_s18 }
 0x483   :  { %v1284_v43 = vpop.eup %1283 }
 0x484   :  { %v428_v44 = vadd.f32 1.0, %v1284_v43 }
 0x486   :  { %1285 = vrcp.f32 %v428_v44 }
 0x493   :  { %v1286_v45 = vpop.eup %1285 }
 0x494   :  { %v432_v48 = vmul.f32 %v1286_v45, %v342_v33 }
 0x4f4   :  { %v435_v46 = vpop.permute.xlu0 %434 }
 0x4f5   :  { %v437_v47 = vmul.f32 %v1286_v45, %v435_v46 }
 0x4f7   :  { %439 = vrot.lane.b32.xlu1 %v437_v47, %s1454_s5 }
 0x569   :  { %v440_v49 = vpop.permute.xlu1 %439 }
 0x56a   :  { %v442_v50 = vadd.f32 %v440_v49, %v432_v48 }
 0x56c   :  { %1287 = vtanh.f32 %v442_v50 }
 0x579   :  { %v1288_v51 = vpop.eup %1287 }
 0x57a   :  { %445 = vrot.lane.b32.xlu0 %v1288_v51, %s1453_s18 }
 0x5ec   :  { %v446_v52 = vpop.permute.xlu0 %445 }
 0x5ed   :  { %v448_v53 = vmul.f32 %v1286_v45, %v446_v52 }
 0x5ef   :  { %450 = vrot.lane.b32.xlu1 %v448_v53, %s1454_s5 }
 0x661   :  { %v451_v54 = vpop.permute.xlu1 %450 }
 0x662   :  { %1062 = vst.msk [vmem:[#allocation10 + $0x2] sm:$0x3] %vm1060_vm3, %v451_v54  ;;  %1204 = vmatmul.mubr.msk.f32.vlgmr.msra.gmra.mxu0 %vm173_vm2, %v451_v54 }
 0x663   :  { %1218 = vmatpush3.msra.mxu0 %v1520_v5  ;;  %1225 = vmatprep.mubr.msk.f32.mxu0 %vm1452_vm0, %v1451_v0 }
 0x664   :  { %1219 = vmatprep.subr.mxu0 %v1451_v0 }
 0x665   :  { %1220 = vmatpush3.msra.mxu0 %v1528_v7 }
 0x666   :  { %1221 = vmatprep.subr.mxu0 %v1451_v0 }
 0x667   :  { %1222 = vmatpush3.msra.mxu0 %v1533_v9 }
 0x668   :  { %1223 = vmatprep.subr.mxu0 %v1451_v0 }
 0x669   :  { %1224 = vmatpush3.msra.mxu0 %v1538_v11 }
 0x66a   :  { %1239 = vmatprep.subr.mxu0 %v1451_v0 }
 0x722   :  { %v520_v55 = vpop.f32.mrf.mxu0 }
 0x723   :  { %v524_v56 = vadd.f32 %v520_v55, %v1571_v21 }
 0x724   :  { %v1205_v57 = vpop.f32.mrf.mxu0 }
 0x725   :  { %1289 = vtanh.f32 %v524_v56  ;;  %v1096_v59 = vmul.f32 -1.442695, %v524_v56 }
 0x727   :  { %1291 = vpow2.f32 %v1096_v59 }
 0x732   :  { %v1290_v58 = vpop.eup %1289 }
 0x733   :  { %534 = vrot.lane.b32.xlu0 %v1290_v58, %s1453_s18 }
 0x734   :  { %v1292_v60 = vpop.eup %1291 }
 0x735   :  { %v528_v61 = vadd.f32 1.0, %v1292_v60 }
 0x737   :  { %1293 = vrcp.f32 %v528_v61 }
 0x744   :  { %v1294_v62 = vpop.eup %1293 }
 0x745   :  { %v532_v2 = vmul.f32 %v1294_v62, %v442_v50 }
 0x7a5   :  { %v535_v63 = vpop.permute.xlu0 %534 }
 0x7a6   :  { %v537_v1 = vmul.f32 %v1294_v62, %v535_v63 }
 0x7a8   :  { %539 = vrot.lane.b32.xlu1 %v537_v1, %s1454_s5 }
 0x81a   :  { %v540_v3 = vpop.permute.xlu1 %539 }
 0x81b   :  { %v542_v4 = vadd.f32 %v540_v3, %v532_v2 }
 0x81d   :  { %1295 = vtanh.f32 %v542_v4 }
 0x82a   :  { %v1296_v6 = vpop.eup %1295 }
 0x82b   :  { %545 = vrot.lane.b32.xlu0 %v1296_v6, %s1453_s18 }
 0x89d   :  { %v546_v8 = vpop.permute.xlu0 %545 }
 0x89e   :  { %v548_v10 = vmul.f32 %v1294_v62, %v546_v8 }
 0x8a0   :  { %550 = vrot.lane.b32.xlu1 %v548_v10, %s1454_s5 }
 0x912   :  { %v551_v12 = vpop.permute.xlu1 %550 }
 0x913   :  { %1063 = vst.msk [vmem:[#allocation10 + $0x4] sm:$0x3] %vm1060_vm3, %v551_v12  ;;  %1215 = vmatmul.mubr.msk.f32.vlgmr.msra.gmra.mxu1 %vm173_vm2, %v551_v12 }
 0x914   :  { %1229 = vmatpush3.msra.mxu1 %v1520_v5  ;;  %1236 = vmatprep.mubr.msk.f32.mxu1 %vm1452_vm0, %v1451_v0 }
 0x915   :  { %1230 = vmatprep.subr.mxu1 %v1451_v0 }
 0x916   :  { %1231 = vmatpush3.msra.mxu1 %v1528_v7 }
 0x917   :  { %1232 = vmatprep.subr.mxu1 %v1451_v0 }
 0x918   :  { %1233 = vmatpush3.msra.mxu1 %v1533_v9 }
 0x919   :  { %1234 = vmatprep.subr.mxu1 %v1451_v0 }
 0x91a   :  { %1235 = vmatpush3.msra.mxu1 %v1538_v11 }
 0x91b   :  { %1250 = vmatprep.subr.mxu1 %v1451_v0 }
 0x9d3   :  { %v620_v13 = vpop.f32.mrf.mxu1 }
 0x9d4   :  { %v624_v14 = vadd.f32 %v620_v13, %v1571_v21 }
 0x9d5   :  { %v1216_v15 = vpop.f32.mrf.mxu1 }
 0x9d6   :  { %1297 = vtanh.f32 %v624_v14  ;;  %v1098_v17 = vmul.f32 -1.442695, %v624_v14 }
 0x9d8   :  { %1299 = vpow2.f32 %v1098_v17 }
 0x9e3   :  { %v1298_v16 = vpop.eup %1297 }
 0x9e4   :  { %634 = vrot.lane.b32.xlu0 %v1298_v16, %s1453_s18 }
 0x9e5   :  { %v1300_v18 = vpop.eup %1299 }
 0x9e6   :  { %v628_v19 = vadd.f32 1.0, %v1300_v18 }
 0x9e8   :  { %1301 = vrcp.f32 %v628_v19 }
 0x9f5   :  { %v1302_v20 = vpop.eup %1301 }
 0x9f6   :  { %v632_v24 = vmul.f32 %v1302_v20, %v542_v4 }
 0xa56   :  { %v635_v22 = vpop.permute.xlu0 %634 }
 0xa57   :  { %v637_v23 = vmul.f32 %v1302_v20, %v635_v22 }
 0xa59   :  { %639 = vrot.lane.b32.xlu1 %v637_v23, %s1454_s5 }
 0xacb   :  { %v640_v25 = vpop.permute.xlu1 %639 }
 0xacc   :  { %v642_v26 = vadd.f32 %v640_v25, %v632_v24 }
 0xace   :  { %1303 = vtanh.f32 %v642_v26 }
 0xadb   :  { %v1304_v27 = vpop.eup %1303 }
 0xadc   :  { %645 = vrot.lane.b32.xlu0 %v1304_v27, %s1453_s18 }
 0xb4e   :  { %v646_v28 = vpop.permute.xlu0 %645 }
 0xb4f   :  { %v648_v29 = vmul.f32 %v1302_v20, %v646_v28 }
 0xb51   :  { %650 = vrot.lane.b32.xlu1 %v648_v29, %s1454_s5 }
 0xbc3   :  { %v651_v30 = vpop.permute.xlu1 %650 }
 0xbc4   :  { %1064 = vst.msk [vmem:[#allocation10 + $0x6] sm:$0x3] %vm1060_vm3, %v651_v30  ;;  %1226 = vmatmul.mubr.msk.f32.vlgmr.msra.gmra.mxu0 %vm173_vm2, %v651_v30 }
 0xbc5   :  { %1240 = vmatpush3.msra.mxu0 %v1520_v5  ;;  %1247 = vmatprep.mubr.msk.f32.mxu0 %vm1452_vm0, %v1451_v0 }
 0xbc6   :  { %1241 = vmatprep.subr.mxu0 %v1451_v0 }
 0xbc7   :  { %1242 = vmatpush3.msra.mxu0 %v1528_v7 }
 0xbc8   :  { %1243 = vmatprep.subr.mxu0 %v1451_v0 }
 0xbc9   :  { %1244 = vmatpush3.msra.mxu0 %v1533_v9 }
 0xbca   :  { %1245 = vmatprep.subr.mxu0 %v1451_v0 }
 0xbcb   :  { %1246 = vmatpush3.msra.mxu0 %v1538_v11 }
 0xc84   :  { %v720_v31 = vpop.f32.mrf.mxu0 }
 0xc85   :  { %v724_v32 = vadd.f32 %v720_v31, %v1571_v21 }
 0xc86   :  { %v1227_v33 = vpop.f32.mrf.mxu0 }
 0xc87   :  { %1305 = vtanh.f32 %v724_v32  ;;  %v1100_v35 = vmul.f32 -1.442695, %v724_v32 }
 0xc89   :  { %1307 = vpow2.f32 %v1100_v35 }
 0xc94   :  { %v1306_v34 = vpop.eup %1305 }
 0xc95   :  { %734 = vrot.lane.b32.xlu0 %v1306_v34, %s1453_s18 }
 0xc96   :  { %v1308_v36 = vpop.eup %1307 }
 0xc97   :  { %v728_v37 = vadd.f32 1.0, %v1308_v36 }
 0xc99   :  { %1309 = vrcp.f32 %v728_v37 }
 0xca6   :  { %v1310_v38 = vpop.eup %1309 }
 0xca7   :  { %v732_v41 = vmul.f32 %v1310_v38, %v642_v26 }
 0xd07   :  { %v735_v39 = vpop.permute.xlu0 %734 }
 0xd08   :  { %v737_v40 = vmul.f32 %v1310_v38, %v735_v39 }
 0xd0a   :  { %739 = vrot.lane.b32.xlu1 %v737_v40, %s1454_s5 }
 0xd7c   :  { %v740_v42 = vpop.permute.xlu1 %739 }
 0xd7d   :  { %v742_v43 = vadd.f32 %v740_v42, %v732_v41 }
 0xd7f   :  { %1311 = vtanh.f32 %v742_v43 }
 0xd8c   :  { %v1312_v44 = vpop.eup %1311 }
 0xd8d   :  { %745 = vrot.lane.b32.xlu0 %v1312_v44, %s1453_s18 }
 0xdff   :  { %v746_v45 = vpop.permute.xlu0 %745 }
 0xe00   :  { %v748_v46 = vmul.f32 %v1310_v38, %v746_v45 }
 0xe02   :  { %750 = vrot.lane.b32.xlu1 %v748_v46, %s1454_s5 }
 0xe74   :  { %v751_v47 = vpop.permute.xlu1 %750 }
 0xe75   :  { %1065 = vst.msk [vmem:[#allocation10 + $0x8] sm:$0x3] %vm1060_vm3, %v751_v47  ;;  %1237 = vmatmul.mubr.msk.f32.vlgmr.msra.gmra.mxu1 %vm173_vm2, %v751_v47 }
 0xe76   :  { %1251 = vmatpush3.msra.mxu1 %v1520_v5  ;;  %1258 = vmatprep.mubr.msk.f32.mxu1 %vm1452_vm0, %v1451_v0 }
 0xe77   :  { %1252 = vmatprep.subr.mxu1 %v1451_v0 }
 0xe78   :  { %1253 = vmatpush3.msra.mxu1 %v1528_v7 }
 0xe79   :  { %1254 = vmatprep.subr.mxu1 %v1451_v0 }
 0xe7a   :  { %1255 = vmatpush3.msra.mxu1 %v1533_v9 }
 0xe7b   :  { %1256 = vmatprep.subr.mxu1 %v1451_v0 }
 0xe7c   :  { %1257 = vmatpush3.msra.mxu1 %v1538_v11 }
 0xf35   :  { %v820_v48 = vpop.f32.mrf.mxu1 }
 0xf36   :  { %v824_v49 = vadd.f32 %v820_v48, %v1571_v21 }
 0xf37   :  { %v1238_v50 = vpop.f32.mrf.mxu1 }
 0xf38   :  { %1313 = vtanh.f32 %v824_v49  ;;  %v1102_v51 = vmul.f32 -1.442695, %v824_v49 }
 0xf3a   :  { %1315 = vpow2.f32 %v1102_v51 }
 0xf45   :  { %v1314_v5 = vpop.eup %1313 }
 0xf46   :  { %834 = vrot.lane.b32.xlu0 %v1314_v5, %s1453_s18 }
 0xf47   :  { %v1316_v52 = vpop.eup %1315 }
 0xf48   :  { %v828_v7 = vadd.f32 1.0, %v1316_v52 }
 0xf4a   :  { %1317 = vrcp.f32 %v828_v7 }
 0xf57   :  { %v1318_v53 = vpop.eup %1317 }
 0xf58   :  { %v832_v0 = vmul.f32 %v1318_v53, %v742_v43 }
 0xfb8   :  { %v835_v54 = vpop.permute.xlu0 %834 }
 0xfb9   :  { %v837_v9 = vmul.f32 %v1318_v53, %v835_v54 }
 0xfbb   :  { %839 = vrot.lane.b32.xlu1 %v837_v9, %s1454_s5 }
0x102d   :  { %v840_v11 = vpop.permute.xlu1 %839 }
0x102e   :  { %v842_v55 = vadd.f32 %v840_v11, %v832_v0 }
0x1030   :  { %1319 = vtanh.f32 %v842_v55 }
0x103d   :  { %v1320_v56 = vpop.eup %1319 }
0x103e   :  { %845 = vrot.lane.b32.xlu0 %v1320_v56, %s1453_s18 }
0x10b0   :  { %v846_v57 = vpop.permute.xlu0 %845 }
0x10b1   :  { %v848_v58 = vmul.f32 %v1318_v53, %v846_v57 }
0x10b3   :  { %850 = vrot.lane.b32.xlu1 %v848_v58, %s1454_s5 }
0x1125   :  { %v851_v59 = vpop.permute.xlu1 %850 }
0x1126   :  { %1066 = vst.msk [vmem:[#allocation10 + $0xa] sm:$0x3] %vm1060_vm3, %v851_v59  ;;  %1248 = vmatmul.mubr.msk.f32.vlgmr.msra.gmra.mxu0 %vm173_vm2, %v851_v59 }
0x11e6   :  { %v920_v60 = vpop.f32.mrf.mxu0 }
0x11e7   :  { %v924_v61 = vadd.f32 %v920_v60, %v1571_v21 }
0x11e8   :  { %v1249_v62 = vpop.f32.mrf.mxu0 }
0x11e9   :  { %1321 = vtanh.f32 %v924_v61  ;;  %v1104_v1 = vmul.f32 -1.442695, %v924_v61 }
0x11eb   :  { %1323 = vpow2.f32 %v1104_v1 }
0x11f6   :  { %v1322_v63 = vpop.eup %1321 }
0x11f7   :  { %934 = vrot.lane.b32.xlu0 %v1322_v63, %s1453_s18 }
0x11f8   :  { %v1324_v2 = vpop.eup %1323 }
0x11f9   :  { %v928_v3 = vadd.f32 1.0, %v1324_v2 }
0x11fb   :  { %1325 = vrcp.f32 %v928_v3 }
0x1208   :  { %v1326_v4 = vpop.eup %1325 }
0x1209   :  { %v932_v10 = vmul.f32 %v1326_v4, %v842_v55 }
0x1269   :  { %v935_v6 = vpop.permute.xlu0 %934 }
0x126a   :  { %v937_v8 = vmul.f32 %v1326_v4, %v935_v6 }
0x126c   :  { %939 = vrot.lane.b32.xlu1 %v937_v8, %s1454_s5 }
0x12de   :  { %v940_v12 = vpop.permute.xlu1 %939 }
0x12df   :  { %v942_v13 = vadd.f32 %v940_v12, %v932_v10 }
0x12e1   :  { %1327 = vtanh.f32 %v942_v13 }
0x12ee   :  { %v1328_v14 = vpop.eup %1327 }
0x12ef   :  { %945 = vrot.lane.b32.xlu0 %v1328_v14, %s1453_s18 }
0x1361   :  { %v946_v15 = vpop.permute.xlu0 %945 }
0x1362   :  { %v948_v16 = vmul.f32 %v1326_v4, %v946_v15 }
0x1364   :  { %950 = vrot.lane.b32.xlu1 %v948_v16, %s1454_s5 }
0x13d6   :  { %v951_v17 = vpop.permute.xlu1 %950 }
0x13d7   :  { %1067 = vst.msk [vmem:[#allocation10 + $0xc] sm:$0x3] %vm1060_vm3, %v951_v17  ;;  %1259 = vmatmul.mubr.msk.f32.vlgmr.msra.gmra.mxu1 %vm173_vm2, %v951_v17 }
0x1497   :  { %v1020_v18 = vpop.f32.mrf.mxu1 }
0x1498   :  { %v1024_v19 = vadd.f32 %v1020_v18, %v1571_v21 }
0x1499   :  { %v1260_v20 = vpop.f32.mrf.mxu1 }
0x149a   :  { %1329 = vtanh.f32 %v1024_v19  ;;  %v1106_v23 = vmul.f32 -1.442695, %v1024_v19 }
0x149c   :  { %1331 = vpow2.f32 %v1106_v23 }
0x14a7   :  { %v1330_v22 = vpop.eup %1329 }
0x14a8   :  { %1034 = vrot.lane.b32.xlu0 %v1330_v22, %s1453_s18 }
0x14a9   :  { %v1332_v24 = vpop.eup %1331 }
0x14aa   :  { %v1028_v25 = vadd.f32 1.0, %v1332_v24 }
0x14ac   :  { %1333 = vrcp.f32 %v1028_v25 }
0x14b9   :  { %v1334_v26 = vpop.eup %1333 }
0x14ba   :  { %v1032_v29 = vmul.f32 %v1334_v26, %v942_v13 }
0x151a   :  { %v1035_v27 = vpop.permute.xlu0 %1034 }
0x151b   :  { %v1037_v28 = vmul.f32 %v1334_v26, %v1035_v27 }
0x151d   :  { %1039 = vrot.lane.b32.xlu1 %v1037_v28, %s1454_s5 }
0x158f   :  { %v1040_v30 = vpop.permute.xlu1 %1039 }
0x1590   :  { %v1042_v31 = vadd.f32 %v1040_v30, %v1032_v29 }
0x1592   :  { %1335 = vtanh.f32 %v1042_v31 }
0x159f   :  { %v1336_v21 = vpop.eup %1335 }
0x15a0   :  { %1045 = vrot.lane.b32.xlu0 %v1336_v21, %s1453_s18 }
0x1612   :  { %v1046_v32 = vpop.permute.xlu0 %1045 }
0x1613   :  { %v1048_v33 = vmul.f32 %v1334_v26, %v1046_v32 }
0x1615   :  { %1050 = vrot.lane.b32.xlu1 %v1048_v33, %s1454_s5 }
0x1687   :  { %v1051_v34 = vpop.permute.xlu1 %1050 }
0x1688   :  { %1068 = vst.msk [vmem:[#allocation10 + $0xe] sm:$0x3] %vm1060_vm3, %v1051_v34 }
0x1689   :  { %1428 = shalt.err (!%p1425_p10)
}
0x168a   :  { %s1456_s22 = smov 2  }
0x168b   :  { %1080 = dma.vmem_to_hbm [thread:$0]  %s1075_s20, 256, %s1687_s6, [#allocation4], %s1454_s5, %s1454_s5, %s1456_s22  }
0x168c   :  { %1443 = dma.done.wait [#allocation4], 256  }
0x168d   :  { %1444 = vsyncadd [#allocation4], 4294967040 }
0x168e   :  { %1084 = vsyncpa [#allocation3], 1 }
0x168f   :  { %1085 = vsyncpa [#allocation6], 1 }
0x1690   :  { %1086 = vsyncpa [#allocation9], 1 }
0x1691   :  { %1087 = vsyncpa [#allocation4], 1 }

</bundles_post_ra>
